<compile_context>
chip_gen: v7x
topology: tpu7x:2x2x1
jax: 0.10.0
libtpu: 0.0.40
codegen_flags: <defaults>
</compile_context>

<pallas_src>
import functools

import jax
import jax.numpy as jnp
from jax import lax
from jax.experimental import pallas as pl
from jax.experimental.pallas import tpu as pltpu


def _lowest_value(dtype):
    """Identity element of `max` for this dtype."""
    dtype = jnp.dtype(dtype)
    if jnp.issubdtype(dtype, jnp.floating):
        if dtype in (jnp.dtype(jnp.float64), jnp.dtype(jnp.float32),
                     jnp.dtype(jnp.bfloat16), jnp.dtype(jnp.float16)):
            return float("-inf")
        return float(jnp.finfo(dtype).min)      # e.g. fp8 e4m3 has no inf
    if jnp.issubdtype(dtype, jnp.integer):
        return int(jnp.iinfo(dtype).min)
    raise TypeError(f"GlobalMaxPool: unsupported feature dtype {dtype}")


def _global_maxpool_kernel(seg_first_ref, seg_last_ref, offsets_ref,
                           x_ref, o_ref, *, tile_n: int, lowest):
    """Tile-major segmented max.

    x_ref : (tile_n, tile_c) current row/channel tile of feats.
    o_ref : (B, 1, tile_c) resident accumulator (same block across row tiles).
    """
    t = pl.program_id(1)                    # row-tile index ("arbitrary" axis)

    @pl.when(t == 0)
    def _init():
        # Segments never touched (empty segments) stay at `lowest`.
        o_ref[...] = jnp.full(o_ref.shape, lowest, dtype=o_ref.dtype)

    r0 = t * tile_n                          # first row covered by this tile
    b0 = seg_first_ref[t]                    # first segment touching this tile
    b1 = seg_last_ref[t]                     # last segment touching this tile

    s0 = offsets_ref[b0]
    e0 = offsets_ref[b0 + 1]
    # Fast path: the whole (full) tile lies inside one segment -> no
    # iota/compare/select, just a reduce + elementwise max.  This is the
    # common case for interior tiles.
    interior = (b0 == b1) & (s0 <= r0) & (r0 + tile_n <= e0)

    @pl.when(interior)
    def _interior():
        m = x_ref[...].max(axis=0, keepdims=True)          # (1, tile_c)
        o_ref[b0] = jnp.maximum(o_ref[b0], m)

    @pl.when(jnp.logical_not(interior))
    def _boundary():
        x = x_ref[...]
        row = r0 + lax.broadcasted_iota(jnp.int32, (tile_n, 1), 0)
        neg = jnp.asarray(lowest, dtype=x.dtype)

        def body(b, carry):
            s = offsets_ref[b]
            e = offsets_ref[b + 1]
            # (row < e) with e <= N also masks the garbage rows of a ragged
            # last tile, so no host-side padding is needed.
            in_seg = (row >= s) & (row < e)
            m = jnp.where(in_seg, x, neg).max(axis=0, keepdims=True)
            o_ref[b] = jnp.maximum(o_ref[b], m)
            return carry

        # Small bounded loop over the few segments straddling this tile.
        lax.fori_loop(b0, b1 + 1, body, 0)


def global_maxpool(feats: jax.Array, offsets: jax.Array, *,
                   tile_n=None, tile_c=None) -> jax.Array:
    """Segmented global max pool.  feats: [N, C], offsets: [B+1] -> [B, C]."""
    N, C = feats.shape
    B = int(offsets.shape[0]) - 1
    dtype = feats.dtype
    itemsize = jnp.dtype(dtype).itemsize
    lowest = _lowest_value(dtype)

    if B <= 0:
        return jnp.zeros((max(B, 0), C), dtype)
    if N == 0:
        return jnp.full((B, C), lowest, dtype)

    # Sublane packing: 8 rows/vreg for 32-bit, 16 for 16-bit, 32 for 8-bit.
    sub = max(8, 32 // max(itemsize, 1))

    # ---- channel tiling ---------------------------------------------------
    # Split lanes only when C is wide (gives v7x's 2nd TensorCore balanced
    # work regardless of offsets); otherwise keep full rows -> contiguous DMA.
    if tile_c is None:
        tile_c = C
        if C >= 1024 and C % 128 == 0:
            for cand_c in range(512, 127, -128):
                if C % cand_c == 0:
                    tile_c = cand_c
                    break
    assert C % tile_c == 0, "tile_c must divide C"
    n_c_tiles = C // tile_c

    # ---- row tiling ---------------------------------------------------------
    # ~2 MiB per input buffer (<= 2048 rows) amortizes the ~0.35 us/step
    # overhead while keeping the double-buffered input tiny vs. VMEM on all
    # generations.  No padding: the last tile may be partial (edge block).
    budget_bytes = 2 << 20
    cand = (budget_bytes // max(tile_c * itemsize, 1)) // sub * sub
    cand = int(max(sub, min(cand, 2048)))
    if tile_n is not None:
        cand = int(max(sub, (int(tile_n) // sub) * sub))
    tile_n = N if cand >= N else cand        # full-dim block when it all fits
    n_tiles = pl.cdiv(N, tile_n)

    # ---- per-tile segment ranges (scalar-prefetched; jit-safe, no host sync)
    off_i32 = offsets.astype(jnp.int32)
    tile_r0 = jnp.arange(n_tiles, dtype=jnp.int32) * tile_n
    tile_rl = jnp.minimum(tile_r0 + (tile_n - 1), N - 1)     # last valid row
    seg_first = jnp.clip(
        jnp.searchsorted(off_i32, tile_r0, side="right") - 1, 0, B - 1
    ).astype(jnp.int32)
    seg_last = jnp.clip(
        jnp.searchsorted(off_i32, tile_rl, side="right") - 1, 0, B - 1
    ).astype(jnp.int32)

    kernel = functools.partial(_global_maxpool_kernel, tile_n=tile_n, lowest=lowest)

    in_buf = tile_n * tile_c * itemsize
    out_buf = B * 8 * tile_c * itemsize        # (B,1,tile_c) pads sublanes to 8
    vmem_limit = int(min(max(2 * (in_buf + out_buf) + (4 << 20), 32 << 20), 48 << 20))

    out = pl.pallas_call(
        kernel,
        out_shape=jax.ShapeDtypeStruct((B, 1, C), dtype),
        grid_spec=pltpu.PrefetchScalarGridSpec(
            num_scalar_prefetch=3,             # seg_first, seg_last, offsets
            grid=(n_c_tiles, n_tiles),
            in_specs=[pl.BlockSpec((tile_n, tile_c),
                                   lambda c, t, sf, sl, off: (t, c))],
            out_specs=pl.BlockSpec((B, 1, tile_c),
                                   lambda c, t, sf, sl, off: (0, 0, c)),
        ),
        compiler_params=pltpu.CompilerParams(
            dimension_semantics=("parallel", "arbitrary"),
            vmem_limit_bytes=vmem_limit,
        ),
    )(seg_first, seg_last, off_i32, feats)
    return out.reshape(B, C)


class GlobalMaxPool:
    """JAX mirror of ss_conv.pool.GlobalMaxPool (no parameters)."""
    # TODO(synk): the SparseTensor input branch of the original forward is not
    # translated; pass (feats, offsets) explicitly.

    def __call__(self, feats, offsets):
        assert offsets is not None
        return global_maxpool(feats, offsets)


def _ref_segmented_max(feats, offsets):
    B = offsets.shape[0] - 1
    rows = []
    for b in range(B):
        s, e = int(offsets[b]), int(offsets[b + 1])
        rows.append(feats[s:e].max(axis=0))
    return jnp.stack(rows)


if __name__ == "__main__":
    root = jax.random.PRNGKey(0)
    k1, k2, k3, k4 = jax.random.split(root, 4)
    pool = GlobalMaxPool()

    # --- Test 1: small f32, single tile, two segments (boundary path) ---
    N1, C1 = 24, 32
    feats1 = jax.random.normal(k1, (N1, C1), dtype=jnp.float32)
    offsets1 = jnp.array([0, 10, N1], dtype=jnp.int32)
    out1 = jax.block_until_ready(pool(feats1, offsets1))
    ref1 = _ref_segmented_max(feats1, offsets1)
    assert out1.shape == (2, C1)
    assert jnp.allclose(out1, ref1, atol=1e-6), "mismatch vs reference (test 1)"

    # --- Test 2: multi-tile f32, skewed segments (fast + boundary paths) ---
    N2, C2 = 2048, 256
    feats2 = jax.random.normal(k2, (N2, C2), dtype=jnp.float32)
    offsets2 = jnp.array([0, 1000, 1003, N2], dtype=jnp.int32)
    out2 = jax.block_until_ready(global_maxpool(feats2, offsets2, tile_n=512))
    ref2 = _ref_segmented_max(feats2, offsets2)
    assert jnp.allclose(out2, ref2, atol=1e-6), "mismatch vs reference (test 2)"

    # Same data under jit (offsets traced) — no host-side fallback needed.
    out2j = jax.block_until_ready(
        jax.jit(functools.partial(global_maxpool, tile_n=512))(feats2, offsets2))
    assert jnp.allclose(out2j, ref2, atol=1e-6), "mismatch vs reference (test 2, jit)"

    # --- Test 3: bf16 with ragged N (not a sublane multiple) ---
    N3, C3 = 40, 128
    feats3 = jax.random.normal(k3, (N3, C3), dtype=jnp.float32).astype(jnp.bfloat16)
    offsets3 = jnp.array([0, 7, N3], dtype=jnp.int32)
    out3 = jax.block_until_ready(global_maxpool(feats3, offsets3))
    ref3 = _ref_segmented_max(feats3, offsets3)
    assert jnp.array_equal(out3, ref3), "mismatch vs reference (test 3)"

    # --- Test 4: partial last tile (N % tile_n != 0), no padding used ---
    N4, C4 = 1000, 128
    feats4 = jax.random.normal(k4, (N4, C4), dtype=jnp.float32)
    offsets4 = jnp.array([0, 300, N4], dtype=jnp.int32)
    out4 = jax.block_until_ready(global_maxpool(feats4, offsets4, tile_n=256))
    ref4 = _ref_segmented_max(feats4, offsets4)
    assert jnp.allclose(out4, ref4, atol=1e-6), "mismatch vs reference (test 4)"

    # --- Test 5: int32 features (dtype-aware identity instead of -inf) ---
    feats5 = jax.random.randint(k1, (48, 128), -1000, 1000, dtype=jnp.int32)
    offsets5 = jnp.array([0, 5, 48], dtype=jnp.int32)
    out5 = jax.block_until_ready(global_maxpool(feats5, offsets5))
    ref5 = _ref_segmented_max(feats5, offsets5)
    assert jnp.array_equal(out5, ref5), "mismatch vs reference (test 5)"

    print("KERNEL_OK")
</pallas_src>

<mosaic_0001>
module attributes {stable_mosaic.version = 11 : i64} {
  func.func @_global_maxpool_kernel(%arg0: i32, %arg1: i32, %arg2: memref<1xi32, #tpu.memory_space<smem>>, %arg3: memref<1xi32, #tpu.memory_space<smem>>, %arg4: memref<3xi32, #tpu.memory_space<smem>>, %arg5: memref<24x32xf32, #tpu.memory_space<vmem>>, %arg6: memref<2x1x32xf32, #tpu.memory_space<vmem>>) attributes {dimension_semantics = [#tpu.dimension_semantics<parallel>, #tpu.dimension_semantics<arbitrary>], iteration_bounds = array<i64: 1, 1>, scalar_prefetch = 3 : i64, scratch_operands = 0 : i64, tpu.core_type = #tpu.core_type<tc>, window_params = [{transform_indices = @transform_0, window_bounds = array<i64: 24, 32>}, {transform_indices = @transform_1, window_bounds = array<i64: 2, 1, 32>}]} {
    %c0_i32 = arith.constant 0 : i32
    %0 = arith.cmpi eq, %arg1, %c0_i32 : i32
    %1 = arith.extui %0 : i1 to i32
    %c0_i32_0 = arith.constant 0 : i32
    %2 = arith.cmpi ne, %1, %c0_i32_0 : i32
    scf.if %2 {
      %cst = arith.constant 0xFF800000 : f32
      %24 = vector.broadcast %cst : f32 to vector<2x1x32xf32>
      %c0 = arith.constant 0 : index
      %c0_4 = arith.constant 0 : index
      %c0_5 = arith.constant 0 : index
      %25 = vector.load %arg6[%c0, %c0_4, %c0_5] : memref<2x1x32xf32, #tpu.memory_space<vmem>>, vector<2x1x32xf32>
      tpu.vector_store %arg6[%c0, %c0_4, %c0_5], %24 {strides = array<i32>} : memref<2x1x32xf32, #tpu.memory_space<vmem>>, vector<2x1x32xf32>,
    } else {
    }
    %c24_i32 = arith.constant 24 : i32
    %3 = arith.muli %arg1, %c24_i32 : i32
    %4 = arith.index_cast %arg1 : i32 to index
    %5 = memref.load %arg2[%4] : memref<1xi32, #tpu.memory_space<smem>>
    %6 = arith.index_cast %arg1 : i32 to index
    %7 = memref.load %arg3[%6] : memref<1xi32, #tpu.memory_space<smem>>
    %8 = arith.index_cast %5 : i32 to index
    %9 = memref.load %arg4[%8] : memref<3xi32, #tpu.memory_space<smem>>
    %c1_i32 = arith.constant 1 : i32
    %10 = arith.addi %5, %c1_i32 : i32
    %11 = arith.index_cast %10 : i32 to index
    %12 = memref.load %arg4[%11] : memref<3xi32, #tpu.memory_space<smem>>
    %13 = arith.cmpi eq, %5, %7 : i32
    %14 = arith.cmpi sle, %9, %3 : i32
    %15 = arith.andi %13, %14 : i1
    %c24_i32_1 = arith.constant 24 : i32
    %16 = arith.addi %3, %c24_i32_1 : i32
    %17 = arith.cmpi sle, %16, %12 : i32
    %18 = arith.andi %15, %17 : i1
    %19 = arith.extui %18 : i1 to i32
    %c0_i32_2 = arith.constant 0 : i32
    %20 = arith.cmpi ne, %19, %c0_i32_2 : i32
    scf.if %20 {
      %c0 = arith.constant 0 : index
      %c0_4 = arith.constant 0 : index
      %24 = vector.load %arg5[%c0, %c0_4] : memref<24x32xf32, #tpu.memory_space<vmem>>, vector<24x32xf32>
      %cst = arith.constant dense<0xFF800000> : vector<32xf32>
      %25 = vector.multi_reduction <maximumf>, %24, %cst [0] : vector<24x32xf32> to vector<32xf32>
      %26 = vector.shape_cast %25 : vector<32xf32> to vector<1x32xf32>
      %27 = arith.index_cast %5 : i32 to index
      %c0_5 = arith.constant 0 : index
      %c0_6 = arith.constant 0 : index
      %28 = vector.load %arg6[%27, %c0_5, %c0_6] : memref<2x1x32xf32, #tpu.memory_space<vmem>>, vector<1x1x32xf32>
      %29 = vector.shape_cast %28 : vector<1x1x32xf32> to vector<1x32xf32>
      %30 = arith.maximumf %29, %26 : vector<1x32xf32>
      %31 = arith.index_cast %5 : i32 to index
      %c0_7 = arith.constant 0 : index
      %c0_8 = arith.constant 0 : index
      %32 = vector.load %arg6[%31, %c0_7, %c0_8] : memref<2x1x32xf32, #tpu.memory_space<vmem>>, vector<1x1x32xf32>
      %33 = vector.shape_cast %32 : vector<1x1x32xf32> to vector<1x32xf32>
      %34 = vector.shape_cast %30 : vector<1x32xf32> to vector<1x1x32xf32>
      tpu.vector_store %arg6[%31, %c0_7, %c0_8], %34 {strides = array<i32>} : memref<2x1x32xf32, #tpu.memory_space<vmem>>, vector<1x1x32xf32>,
    } else {
    }
    %true = arith.constant true
    %21 = arith.xori %18, %true : i1
    %22 = arith.extui %21 : i1 to i32
    %c0_i32_3 = arith.constant 0 : i32
    %23 = arith.cmpi ne, %22, %c0_i32_3 : i32
    scf.if %23 {
      %c0 = arith.constant 0 : index
      %c0_4 = arith.constant 0 : index
      %24 = vector.load %arg5[%c0, %c0_4] : memref<24x32xf32, #tpu.memory_space<vmem>>, vector<24x32xf32>
      %25 = tpu.iota {dimensions = array<i32: 0>} : vector<24x1xi32>
      %26 = vector.broadcast %3 : i32 to vector<24x1xi32>
      %27 = arith.addi %26, %25 : vector<24x1xi32>
      %c1_i32_5 = arith.constant 1 : i32
      %28 = arith.addi %7, %c1_i32_5 : i32
      %c0_i32_6 = arith.constant 0 : i32
      %cst = arith.constant 0xFF800000 : f32
      %29 = arith.subi %28, %5 : i32
      %30 = arith.addi %5, %29 : i32
      %c1_i32_7 = arith.constant 1 : i32
      scf.for %arg7 = %5 to %30 step %c1_i32_7  : i32 {
        %31 = arith.index_cast %arg7 : i32 to index
        %32 = memref.load %arg4[%31] : memref<3xi32, #tpu.memory_space<smem>>
        %c1_i32_8 = arith.constant 1 : i32
        %33 = arith.addi %arg7, %c1_i32_8 : i32
        %34 = arith.index_cast %33 : i32 to index
        %35 = memref.load %arg4[%34] : memref<3xi32, #tpu.memory_space<smem>>
        %36 = vector.broadcast %32 : i32 to vector<24x1xi32>
        %37 = arith.cmpi sge, %27, %36 : vector<24x1xi32>
        %38 = vector.broadcast %35 : i32 to vector<24x1xi32>
        %39 = arith.cmpi slt, %27, %38 : vector<24x1xi32>
        %40 = arith.andi %37, %39 : vector<24x1xi1>
        %41 = vector.shape_cast %40 : vector<24x1xi1> to vector<24x1xi1>
        %42 = vector.broadcast %41 : vector<24x1xi1> to vector<24x32xi1>
        %43 = vector.broadcast %cst : f32 to vector<24x32xf32>
        %44 = arith.select %42, %24, %43 : vector<24x32xi1>, vector<24x32xf32>
        %cst_9 = arith.constant dense<0xFF800000> : vector<32xf32>
        %45 = vector.multi_reduction <maximumf>, %44, %cst_9 [0] : vector<24x32xf32> to vector<32xf32>
        %46 = vector.shape_cast %45 : vector<32xf32> to vector<1x32xf32>
        %47 = arith.index_cast %arg7 : i32 to index
        %c0_10 = arith.constant 0 : index
        %c0_11 = arith.constant 0 : index
        %48 = vector.load %arg6[%47, %c0_10, %c0_11] : memref<2x1x32xf32, #tpu.memory_space<vmem>>, vector<1x1x32xf32>
        %49 = vector.shape_cast %48 : vector<1x1x32xf32> to vector<1x32xf32>
        %50 = arith.maximumf %49, %46 : vector<1x32xf32>
        %51 = arith.index_cast %arg7 : i32 to index
        %c0_12 = arith.constant 0 : index
        %c0_13 = arith.constant 0 : index
        %52 = vector.load %arg6[%51, %c0_12, %c0_13] : memref<2x1x32xf32, #tpu.memory_space<vmem>>, vector<1x1x32xf32>
        %53 = vector.shape_cast %52 : vector<1x1x32xf32> to vector<1x32xf32>
        %54 = vector.shape_cast %50 : vector<1x32xf32> to vector<1x1x32xf32>
        tpu.vector_store %arg6[%51, %c0_12, %c0_13], %54 {strides = array<i32>} : memref<2x1x32xf32, #tpu.memory_space<vmem>>, vector<1x1x32xf32>,
      }
    } else {
    }
    return
  }
  func.func @transform_0(%arg0: i32, %arg1: i32, %arg2: memref<1xi32, #tpu.memory_space<smem>>, %arg3: memref<1xi32, #tpu.memory_space<smem>>, %arg4: memref<3xi32, #tpu.memory_space<smem>>) -> (i32, i32) {
    %c0_i32 = arith.constant 0 : i32
    return %arg1, %arg0 : i32, i32
  }
  func.func @transform_1(%arg0: i32, %arg1: i32, %arg2: memref<1xi32, #tpu.memory_space<smem>>, %arg3: memref<1xi32, #tpu.memory_space<smem>>, %arg4: memref<3xi32, #tpu.memory_space<smem>>) -> (i32, i32, i32) {
    %c0_i32 = arith.constant 0 : i32
    %c0_i32_0 = arith.constant 0 : i32
    %c0_i32_1 = arith.constant 0 : i32
    return %c0_i32, %c0_i32_0, %arg0 : i32, i32, i32
  }
}

</mosaic_0001>

<bundles_post_ra>
// kernel: tpu_custom_call.1
= control target key start
LH: loop header
LB: loop body
LE: loop exit
PB: predicated region body
PF: predicated region fallthrough
CT: control target
= control target key end

     0   :  { %s368_s0 = inlined_call_operand.<no memory space> [shape: s32[1], index: 0, kind: input, shape index: {}]   ;;  %s369_s1 = inlined_call_operand.<no memory space> [shape: s32[1], index: 1, kind: input, shape index: {}]   ;;  %s370_s2 = inlined_call_operand.vmem [shape: s32[3], index: 2, kind: input, shape index: {}]   ;;  %s371_s3 = inlined_call_operand.hbm [shape: f32[24,32], index: 3, kind: input, shape index: {}]   ;;  %s372_s4 = inlined_call_operand.hbm [shape: f32[2,1,32], index: 4, kind: output, shape index: {}]  }
   0x1   :  { %s11_s17 = sshll.u32 %s370_s2, 4  ;;  %s12_s17 = int_to_ptr.vmem [resolvable:$true] %s11_s17 }
   0x2   :  { %s179_s18 = scalar_lea.vmem %s12_s17, 16  ;;  %p184_p1 = scmp.lt.s32.totalorder %s12_s17, %s12_s17 }
   0x3   :  { %p180_p0 = scmp.ne.s32.totalorder %s12_s17, %s179_s18  ;;  %p185_p2 = scmp.lt.s32.totalorder %s179_s18, %s179_s18 }
   0x5   :  { %p186_p3 = por %p185_p2, %p184_p1 }
   0x7   :  { %p187_p4 = pnand %p186_p3, %p180_p0 }
   0x9   :  { %190 = shalt.err (!%p187_p4)  }
   0xa   :  { %s249_s19 = smov [#allocation5]  }
   0xb   :  { %14 = dma.vmem_to_smem %s12_s17, 16, %s249_s19, [#allocation2] }
   0xc   :  { %239 = dma.done.wait [#allocation2], 16 }
   0xd   :  { %240 = vsyncadd [#allocation2], 4294967280 }
   0xe   :  { %16 = sfence }
   0xf   :  { %17 = vsyncpa [#allocation7], 0 }
  0x10   :  { %18 = vsyncpa [#allocation8], 0  ;;  %s250_s20 = smov [#allocation6]   ;;  %s191_s23 = scalar_lea.hbm %s371_s3, 384 }
  0x11   :  { %s24_s21 = sshll.u32 %s250_s20, 4  ;;  %p192_p5 = scmp.ne.s32.totalorder %s371_s3, %s191_s23  ;;  %s25_s21 = int_to_ptr.vmem [resolvable:$true] %s24_s21 }
  0x12   :  { %p195_p6 = scmp.lt.u32.totalorder %s191_s23, %s371_s3 }
  0x14   :  { %p197_p7 = pnand %p195_p6, %p192_p5 }
  0x16   :  { %200 = shalt.err (!%p197_p7)
}
  0x17   :  { %s201_s28 = scalar_lea.vmem %s25_s21, 384  ;;  %p206_p9 = scmp.lt.s32.totalorder %s25_s21, %s25_s21 }
  0x18   :  { %p202_p8 = scmp.ne.s32.totalorder %s25_s21, %s201_s28  ;;  %p207_p10 = scmp.lt.s32.totalorder %s201_s28, %s201_s28 }
  0x1a   :  { %p208_p11 = por %p207_p10, %p206_p9 }
  0x1c   :  { %p209_p12 = pnand %p208_p11, %p202_p8 }
  0x1e   :  { %212 = shalt.err (!%p209_p12)
}
  0x1f   :  { %s251_s29 = smov 128   ;;  %s252_s30 = smov 8  }
  0x20   :  { %30 = dma.hbm_to_vmem [thread:$0]  %s371_s3, 384, %s25_s21, [#allocation7], %s251_s29, %s251_s29, %s252_s30  }
  0x21   :  { %241 = dma.done.wait [#allocation7], 384  }
  0x22   :  { %242 = vsyncadd [#allocation7], 4294966912  ;;  %s45_s9 = sadd.s32 1, %s368_s0  ;;  %vm38_vm0 = vcmask 253952   ;;  %s44_s12 = sld [smem:[#allocation5 + %s368_s0]]  ;;  %v253_v0 = vmov -inf  }
  0x23   :  { %s46_s13 = sld [smem:[#allocation5 + %s45_s9]]  ;;  %39 = vst.msk [vmem:[#allocation9] sm:$0x1] %vm38_vm0, %v253_v0  ;;  %40 = vst.msk [vmem:[#allocation9 + $0x1] sm:$0x1] %vm38_vm0, %v253_v0  ;;  %p47_p13 = scmp.eq.s32.totalorder %s368_s0, %s369_s1 }
  0x28   :  { %p48_p0 = scmp.le.s32.totalorder %s44_s12, 0 }
  0x29   :  { %p162_p2 = scmp.ge.s32.totalorder %s46_s13, 24 }
  0x2a   :  { %p49_p1 = pnand %p48_p0, %p47_p13 }
  0x2c   :  { %p50_p3 = pneg %p49_p1 }
  0x2e   :  { %p311_p4 = pnand %p162_p2, %p50_p3 }
  0x2f   :  { %v57_v1 = vld [vmem:[#allocation6] sm:$0xff] (!%p311_p4)  ;;  %v58_v2 = vld [vmem:[#allocation6 + $0x8] sm:$0xff] (!%p311_p4)  ;;  %v59_v3 = vld [vmem:[#allocation6 + $0x10] sm:$0xff] (!%p311_p4)  ;;  %vm60_vm1 = vcmask (!%p311_p4), 261120   ;;  %s72_s20 = scalar_lea.vmem (!%p311_p4), [#allocation9], %s368_s0 }
  0x30   :  { %56 = sbr.rel (%p311_p4) target bundleno = 68 (0x44), region = 17  ;;  %v61_v4 = vsel (!%p311_p4), %vm60_vm1, %v57_v1, -inf  ;;  %v62_v5 = vsel (!%p311_p4), %vm60_vm1, %v58_v2, -inf  ;;  %v63_v6 = vsel (!%p311_p4), %vm60_vm1, %v59_v3, -inf  ;;  %v73_v14 = vld [vmem:[%s72_s20] sm:$0x1] (!%p311_p4) }
  0x31   :  { %v64_v7 = vmax.f32 (!%p311_p4), %v61_v4, %v62_v5 }
  0x33   :  { %v65_v8 = vmax.f32 (!%p311_p4), %v64_v7, %v63_v6 }
  0x35   :  { %v66_v9 = vrot.slane (!%p311_p4), %v65_v8, 4 }
  0x37   :  { %v67_v10 = vmax.f32 %v65_v8, %v66_v9 }
  0x39   :  { %v68_v11 = vrot.slane %v67_v10, 2 }
  0x3b   :  { %v69_v12 = vmax.f32 %v67_v10, %v68_v11 }
  0x3d   :  { %v70_v13 = vrot.slane %v69_v12, 1 }
  0x3f   :  { %v71_v15 = vmax.f32 %v69_v12, %v70_v13 }
  0x41   :  { %v74_v16 = vmax.f32 %v73_v14, %v71_v15 }
  0x43   :  { %76 = vst.msk [vmem:[%s72_s20] sm:$0x1] %vm38_vm0, %v74_v16 }
  0x44 PF:  { %79 = sbr.rel (!%p311_p4) target bundleno = 114 (0x72), region = 21  ;;  %v80_v17 = vld [vmem:[#allocation6] sm:$0xff] (%p311_p4)  ;;  %v81_v18 = vld [vmem:[#allocation6 + $0x8] sm:$0xff] (%p311_p4)  ;;  %v82_v19 = vld [vmem:[#allocation6 + $0x10] sm:$0xff] (%p311_p4)  ;;  %v83_v20 = vlaneseq (%p311_p4)  ;;  %s91_s2 = sadd.s32 (%p311_p4), 1, %s369_s1 }
  0x45   :  { %p158_p5 = scmp.ge.s32.totalorder (%p311_p4), %s368_s0, %s91_s2 }
  0x46   :  { %v84_v21 = vshrl.u32 (%p311_p4), %v83_v20, 7 }
  0x48   :  { %v85_v22 = vadd.s32 (%p311_p4), 8, %v84_v21  ;;  %v86_v23 = vadd.s32 (%p311_p4), 16, %v84_v21 }
  0x4b   :  { %159 = sbr.rel (%p158_p5) target bundleno = 114 (0x72), region = 43 }
  0x52 LB: > { %s98_s29 = sld [smem:[#allocation5 + %s247_s0]]  ;;  %s343_s30 = sadd.s32 1, %s247_s0   ;;  %vm121_vm4 = vcmask 261120   ;;  %s247_s0 = sphi %s368_s0, %s374_s0  }
  0x53   : > { %s100_s5 = sld [smem:[#allocation5 + %s343_s30]]  ;;  %s133_s6 = scalar_lea.vmem [#allocation9], %s247_s0 }
  0x54   : > { %v134_v39 = vld [vmem:[%s133_s6] sm:$0x1]  ;;  %p94_p6 = scmp.ge.s32.totalorder %s343_s30, %s91_s2  ;;  %s374_s0 = smov %s343_s30 }
  0x58   : > { %v101_v24 = vstv %s98_s29 }
  0x59   : > { %vm102_vm2 = vcmp.ge.s32.totalorder %v84_v21, %v101_v24  ;;  %vm103_vm3 = vcmp.ge.s32.totalorder %v85_v22, %v101_v24  ;;  %v105_v25 = vstv %s100_s5  ;;  %vm104_vm5 = vcmp.ge.s32.totalorder %v86_v23, %v101_v24 }
  0x5a   : > { %vm106_vm6 = vcmp.lt.s32.totalorder %v84_v21, %v105_v25  ;;  %vm107_vm7 = vcmp.lt.s32.totalorder %v85_v22, %v105_v25  ;;  %vm108_vm8 = vcmp.lt.s32.totalorder %v86_v23, %v105_v25 }
  0x5b   : > { %vm109_vm9 = vmand %vm102_vm2, %vm106_vm6 }
  0x5c   : > { %vm110_vm10 = vmand %vm103_vm3, %vm107_vm7  ;;  %v118_v26 = vsel %vm109_vm9, %v80_v17, -inf }
  0x5d   : > { %vm111_vm11 = vmand %vm104_vm5, %vm108_vm8  ;;  %v119_v27 = vsel %vm110_vm10, %v81_v18, -inf  ;;  %v122_v28 = vsel %vm121_vm4, %v118_v26, -inf }
  0x5e   : > { %v120_v29 = vsel %vm111_vm11, %v82_v19, -inf  ;;  %v123_v30 = vsel %vm121_vm4, %v119_v27, -inf }
  0x5f   : > { %v124_v31 = vsel %vm121_vm4, %v120_v29, -inf  ;;  %v125_v32 = vmax.f32 %v122_v28, %v123_v30 }
  0x61   : > { %v126_v33 = vmax.f32 %v125_v32, %v124_v31 }
  0x63   : > { %v127_v34 = vrot.slane %v126_v33, 4 }
  0x65   : > { %v128_v35 = vmax.f32 %v126_v33, %v127_v34 }
  0x67   : > { %v129_v36 = vrot.slane %v128_v35, 2 }
  0x69   : > { %v130_v37 = vmax.f32 %v128_v35, %v129_v36 }
  0x6b   : > { %v131_v38 = vrot.slane %v130_v37, 1  ;;  %97 = sbr.rel (!%p94_p6) target bundleno = 82 (0x52), region = 49 }
  0x6d   : > { %v132_v40 = vmax.f32 %v130_v37, %v131_v38 }
  0x6f   : > { %v135_v41 = vmax.f32 %v134_v39, %v132_v40 }
  0x71   : > { %137 = vst.msk [vmem:[%s133_s6] sm:$0x1] %vm38_vm0, %v135_v41 }
  0x72 PF:  { %s254_s9 = smov [#allocation9]  }
  0x73   :  { %s143_s10 = sshll.u32 %s254_s9, 4  ;;  %s144_s10 = int_to_ptr.vmem [resolvable:$true] %s143_s10 }
  0x74   :  { %s213_s0 = scalar_lea.vmem %s144_s10, 32  ;;  %p218_p8 = scmp.lt.s32.totalorder %s144_s10, %s144_s10 }
  0x75   :  { %p214_p7 = scmp.ne.s32.totalorder %s144_s10, %s213_s0  ;;  %p219_p9 = scmp.lt.s32.totalorder %s213_s0, %s213_s0 }
  0x77   :  { %p220_p10 = por %p219_p9, %p218_p8 }
  0x79   :  { %p221_p11 = pnand %p220_p10, %p214_p7 }
  0x7b   :  { %224 = shalt.err (!%p221_p11)
}
  0x7c   :  { %s225_s13 = scalar_lea.hbm %s372_s4, 32 }
  0x7d   :  { %p226_p12 = scmp.ne.s32.totalorder %s372_s4, %s225_s13  ;;  %p229_p13 = scmp.lt.u32.totalorder %s225_s13, %s372_s4 }
  0x7f   :  { %p231_p0 = pnand %p229_p13, %p226_p12 }
  0x81   :  { %234 = shalt.err (!%p231_p0)
}
  0x82   :  { %s255_s16 = smov 16   ;;  %s256_s17 = smov 1  }
  0x83   :  { %149 = dma.vmem_to_hbm [thread:$0]  %s144_s10, 32, %s372_s4, [#allocation8], %s255_s16, %s255_s16, %s256_s17  }
  0x84   :  { %243 = dma.done.wait [#allocation8], 32  }
  0x85   :  { %244 = vsyncadd [#allocation8], 4294967264 }
  0x86   :  { %153 = vsyncpa [#allocation7], 1 }
  0x87   :  { %154 = vsyncpa [#allocation8], 1 }

</bundles_post_ra>
